<compile_context>
chip_gen: v7x
topology: tpu7x:2x2x1
jax: 0.10.0
libtpu: 0.0.40
codegen_flags: <defaults>
</compile_context>

<pallas_src>
import jax
import jax.numpy as jnp
from jax.experimental import pallas as pl
from jax.experimental.pallas import tpu as pltpu


def _mae_kernel(pred_ref, target_ref, out_ref):
    # Elementwise absolute error on the current VMEM tile (VPU work only).
    out_ref[...] = jnp.abs(pred_ref[...] - target_ref[...])


def _round_up(x: int, m: int) -> int:
    return ((x + m - 1) // m) * m


def mae_loss(
    pred: jax.Array,
    target: jax.Array,
    natoms: jax.Array | None = None,
    *,
    tile_bytes: int = 2 * 1024 * 1024,   # ~2 MiB per block per array
    max_tile_n: int = 2048,              # bound lane-dim tile (multiple of 128)
) -> jax.Array:
    """|pred - target| with no reduction, computed in a Pallas TPU kernel."""
    # natoms is intentionally unused (matches MAELoss.forward).
    assert pred.shape == target.shape, "pred/target shape mismatch"
    assert pred.dtype == target.dtype, "pred/target dtype mismatch"

    orig_shape = pred.shape

    # Collapse to a 2-D [rows, lanes] view (elementwise op -> layout-free).
    if pred.ndim == 0:
        p2, t2 = pred.reshape(1, 1), target.reshape(1, 1)
    elif pred.ndim == 1:
        p2, t2 = pred.reshape(1, -1), target.reshape(1, -1)
    else:
        p2 = pred.reshape(-1, orig_shape[-1])
        t2 = target.reshape(-1, orig_shape[-1])
    M, N = p2.shape

    itemsize = jnp.dtype(pred.dtype).itemsize
    sublane = max(8, 32 // itemsize)   # 8 (f32), 16 (bf16/f16), 32 (i8/fp8)
    lane = 128

    # Lane-dim tile: full (lane-aligned) width if narrow, otherwise bounded.
    n_aligned = _round_up(N, lane)
    tile_n = min(n_aligned, max_tile_n)

    # Row-dim tile: target ~tile_bytes per block, clamped to the array extent.
    m_aligned = _round_up(M, sublane)
    rows_for_target = max(1, tile_bytes // (tile_n * itemsize))
    tile_m = min(_round_up(rows_for_target, sublane), m_aligned)
    tile_m = max(tile_m, sublane)

    # Pad (only if needed) so tiles divide the array; sliced off afterwards.
    M_pad = _round_up(M, tile_m)
    N_pad = _round_up(N, tile_n)
    padded = (M_pad, N_pad) != (M, N)
    if padded:
        p2 = jnp.pad(p2, ((0, M_pad - M), (0, N_pad - N)))
        t2 = jnp.pad(t2, ((0, M_pad - M), (0, N_pad - N)))

    grid = (M_pad // tile_m, N_pad // tile_n)
    block = pl.BlockSpec((tile_m, tile_n), lambda i, j: (i, j))

    out = pl.pallas_call(
        _mae_kernel,
        out_shape=jax.ShapeDtypeStruct((M_pad, N_pad), pred.dtype),
        grid_spec=pltpu.PrefetchScalarGridSpec(
            num_scalar_prefetch=0,
            grid=grid,
            in_specs=[block, block],
            out_specs=block,
        ),
        compiler_params=pltpu.CompilerParams(
            dimension_semantics=("parallel", "parallel"),
            vmem_limit_bytes=64 << 20,
        ),
    )(p2, t2)

    if padded:
        out = out[:M, :N]
    return out.reshape(orig_shape)


if __name__ == "__main__":
    key = jax.random.PRNGKey(0)
    k1, k2, k3, k4 = jax.random.split(key, 4)

    # Small, module-consistent shapes: per-sample predictions/targets.
    M, N = 16, 128
    pred = jax.random.normal(k1, (M, N), dtype=jnp.float32)
    target = jax.random.normal(k2, (M, N), dtype=jnp.float32)
    natoms = jnp.full((M,), 4, dtype=jnp.int32)  # unused, as in the PyTorch module

    out = mae_loss(pred, target, natoms)
    out = jax.block_until_ready(out)

    ref = jnp.abs(pred - target)
    assert out.shape == ref.shape and out.dtype == ref.dtype
    assert jnp.allclose(out, ref, atol=0, rtol=0)

    # Second check: odd, non-tile-aligned 3-D shape exercises the pad/slice path.
    pred2 = jax.random.normal(k3, (10, 3, 40), dtype=jnp.float32)
    target2 = jax.random.normal(k4, (10, 3, 40), dtype=jnp.float32)
    out2 = jax.block_until_ready(mae_loss(pred2, target2, None))
    ref2 = jnp.abs(pred2 - target2)
    assert out2.shape == ref2.shape and out2.dtype == ref2.dtype
    assert jnp.allclose(out2, ref2, atol=0, rtol=0)

    print("KERNEL_OK")
</pallas_src>

<mosaic_0001>
module attributes {stable_mosaic.version = 11 : i64} {
  func.func @_mae_kernel(%arg0: i32, %arg1: i32, %arg2: memref<16x128xf32, #tpu.memory_space<vmem>>, %arg3: memref<16x128xf32, #tpu.memory_space<vmem>>, %arg4: memref<16x128xf32, #tpu.memory_space<vmem>>) attributes {dimension_semantics = [#tpu.dimension_semantics<parallel>, #tpu.dimension_semantics<parallel>], iteration_bounds = array<i64: 1, 1>, scalar_prefetch = 0 : i64, scratch_operands = 0 : i64, tpu.core_type = #tpu.core_type<tc>, window_params = [{transform_indices = @transform_0, window_bounds = array<i64: 16, 128>}, {transform_indices = @transform_1, window_bounds = array<i64: 16, 128>}, {transform_indices = @transform_2, window_bounds = array<i64: 16, 128>}]} {
    %c0 = arith.constant 0 : index
    %c0_0 = arith.constant 0 : index
    %0 = vector.load %arg2[%c0, %c0_0] : memref<16x128xf32, #tpu.memory_space<vmem>>, vector<16x128xf32>
    %c0_1 = arith.constant 0 : index
    %c0_2 = arith.constant 0 : index
    %1 = vector.load %arg3[%c0_1, %c0_2] : memref<16x128xf32, #tpu.memory_space<vmem>>, vector<16x128xf32>
    %2 = arith.subf %0, %1 : vector<16x128xf32>
    %3 = math.absf %2 : vector<16x128xf32>
    %c0_3 = arith.constant 0 : index
    %c0_4 = arith.constant 0 : index
    %4 = vector.load %arg4[%c0_3, %c0_4] : memref<16x128xf32, #tpu.memory_space<vmem>>, vector<16x128xf32>
    tpu.vector_store %arg4[%c0_3, %c0_4], %3 {strides = array<i32>} : memref<16x128xf32, #tpu.memory_space<vmem>>, vector<16x128xf32>,
    return
  }
  func.func @transform_0(%arg0: i32, %arg1: i32) -> (i32, i32) {
    %c0_i32 = arith.constant 0 : i32
    return %arg0, %arg1 : i32, i32
  }
  func.func @transform_1(%arg0: i32, %arg1: i32) -> (i32, i32) {
    %c0_i32 = arith.constant 0 : i32
    return %arg0, %arg1 : i32, i32
  }
  func.func @transform_2(%arg0: i32, %arg1: i32) -> (i32, i32) {
    %c0_i32 = arith.constant 0 : i32
    return %arg0, %arg1 : i32, i32
  }
}

</mosaic_0001>

<bundles_post_ra>
// kernel: tpu_custom_call.1
= control target key start
LH: loop header
LB: loop body
LE: loop exit
PB: predicated region body
PF: predicated region fallthrough
CT: control target
= control target key end

     0   :  { %7 = vsyncpa [#allocation3], 0  ;;  %s210_s0 = inlined_call_operand.hbm [shape: f32[16,128], index: 0, kind: input, shape index: {}]   ;;  %s211_s1 = inlined_call_operand.hbm [shape: f32[16,128], index: 1, kind: input, shape index: {}]   ;;  %s212_s2 = inlined_call_operand.hbm [shape: f32[16,128], index: 2, kind: output, shape index: {}]  }
   0x1   :  { %8 = vsyncpa [#allocation6], 0 }
   0x2   :  { %9 = vsyncpa [#allocation4], 0  ;;  %s145_s9 = smov [#allocation2]   ;;  %s73_s13 = scalar_lea.hbm %s210_s0, 256 }
   0x3   :  { %s15_s10 = sshll.u32 %s145_s9, 4  ;;  %p74_p0 = scmp.ne.s32.totalorder %s210_s0, %s73_s13  ;;  %s16_s10 = int_to_ptr.vmem [resolvable:$true] %s15_s10 }
   0x4   :  { %p77_p1 = scmp.lt.u32.totalorder %s73_s13, %s210_s0 }
   0x6   :  { %p79_p2 = pnand %p77_p1, %p74_p0 }
   0x8   :  { %82 = shalt.err (!%p79_p2)
}
   0x9   :  { %s83_s18 = scalar_lea.vmem %s16_s10, 256  ;;  %p88_p4 = scmp.lt.s32.totalorder %s16_s10, %s16_s10 }
   0xa   :  { %p84_p3 = scmp.ne.s32.totalorder %s16_s10, %s83_s18  ;;  %p89_p5 = scmp.lt.s32.totalorder %s83_s18, %s83_s18 }
   0xc   :  { %p90_p6 = por %p89_p5, %p88_p4 }
   0xe   :  { %p91_p7 = pnand %p90_p6, %p84_p3 }
  0x10   :  { %94 = shalt.err (!%p91_p7)
}
  0x11   :  { %s146_s19 = smov 128   ;;  %s147_s20 = smov 8  }
  0x12   :  { %21 = dma.hbm_to_vmem [thread:$0]  %s210_s0, 256, %s16_s10, [#allocation3], %s146_s19, %s146_s19, %s147_s20  }
  0x13   :  { %s148_s23 = smov [#allocation5]   ;;  %s95_s27 = scalar_lea.hbm %s211_s1, 256 }
  0x14   :  { %s27_s24 = sshll.u32 %s148_s23, 4  ;;  %p96_p8 = scmp.ne.s32.totalorder %s211_s1, %s95_s27  ;;  %s28_s24 = int_to_ptr.vmem [resolvable:$true] %s27_s24 }
  0x15   :  { %p99_p9 = scmp.lt.u32.totalorder %s95_s27, %s211_s1 }
  0x17   :  { %p101_p10 = pnand %p99_p9, %p96_p8 }
  0x19   :  { %104 = shalt.err (!%p101_p10)
}
  0x1a   :  { %s105_s4 = scalar_lea.vmem %s28_s24, 256  ;;  %p110_p12 = scmp.lt.s32.totalorder %s28_s24, %s28_s24 }
  0x1b   :  { %p106_p11 = scmp.ne.s32.totalorder %s28_s24, %s105_s4  ;;  %p111_p13 = scmp.lt.s32.totalorder %s105_s4, %s105_s4 }
  0x1d   :  { %p112_p0 = por %p111_p13, %p110_p12 }
  0x1f   :  { %p113_p1 = pnand %p112_p0, %p106_p11 }
  0x21   :  { %116 = shalt.err (!%p113_p1)
}
  0x22   :  { %33 = dma.hbm_to_vmem [thread:$0]  %s211_s1, 256, %s28_s24, [#allocation6], %s146_s19, %s146_s19, %s147_s20  }
  0x23   :  { %139 = dma.done.wait [#allocation3], 256  }
  0x24   :  { %140 = vsyncadd [#allocation3], 4294967040 }
  0x25   :  { %141 = dma.done.wait [#allocation6], 256  }
  0x26   :  { %142 = vsyncadd [#allocation6], 4294967040  ;;  %v40_v0 = vld [vmem:[#allocation2] sm:$0xff]  ;;  %v42_v1 = vld [vmem:[#allocation5] sm:$0xff]  ;;  %s149_s6 = smov [#allocation7]  }
  0x27   :  { %v41_v2 = vld [vmem:[#allocation2 + $0x8] sm:$0xff]  ;;  %v44_v3 = vsub.f32 %v40_v0, %v42_v1  ;;  %v43_v4 = vld [vmem:[#allocation5 + $0x8] sm:$0xff]  ;;  %s55_s7 = sshll.u32 %s149_s6, 4  ;;  %s56_s7 = int_to_ptr.vmem [resolvable:$true] %s55_s7 }
  0x28   :  { %v45_v5 = vsub.f32 %v41_v2, %v43_v4  ;;  %s117_s8 = scalar_lea.vmem %s56_s7, 256  ;;  %p122_p3 = scmp.lt.s32.totalorder %s56_s7, %s56_s7 }
  0x29   :  { %v46_v6 = vand.u32 2147483647, %v44_v3  ;;  %p118_p2 = scmp.ne.s32.totalorder %s56_s7, %s117_s8  ;;  %p123_p4 = scmp.lt.s32.totalorder %s117_s8, %s117_s8 }
  0x2a   :  { %v47_v7 = vand.u32 2147483647, %v45_v5 }
  0x2b   :  { %48 = vst [vmem:[#allocation7] sm:$0xff] %v46_v6  ;;  %p124_p5 = por %p123_p4, %p122_p3 }
  0x2c   :  { %49 = vst [vmem:[#allocation7 + $0x8] sm:$0xff] %v47_v7 }
  0x2d   :  { %p125_p6 = pnand %p124_p5, %p118_p2 }
  0x2f   :  { %128 = shalt.err (!%p125_p6)
}
  0x30   :  { %s129_s10 = scalar_lea.hbm %s212_s2, 256 }
  0x31   :  { %p130_p7 = scmp.ne.s32.totalorder %s212_s2, %s129_s10  ;;  %p133_p8 = scmp.lt.u32.totalorder %s129_s10, %s212_s2 }
  0x33   :  { %p135_p9 = pnand %p133_p8, %p130_p7 }
  0x35   :  { %138 = shalt.err (!%p135_p9)
}
  0x36   :  { %61 = dma.vmem_to_hbm [thread:$0]  %s56_s7, 256, %s212_s2, [#allocation4], %s146_s19, %s146_s19, %s147_s20  }
  0x37   :  { %143 = dma.done.wait [#allocation4], 256  }
  0x38   :  { %144 = vsyncadd [#allocation4], 4294967040 }
  0x39   :  { %65 = vsyncpa [#allocation3], 1 }
  0x3a   :  { %66 = vsyncpa [#allocation6], 1 }
  0x3b   :  { %67 = vsyncpa [#allocation4], 1 }

</bundles_post_ra>
